<compile_context>
chip_gen: v7x
topology: tpu7x:2x2x1
jax: 0.10.0
libtpu: 0.0.40
codegen_flags: <defaults>
</compile_context>

<pallas_src>
import functools

import jax
import jax.numpy as jnp
from jax.experimental import pallas as pl
from jax.experimental.pallas import tpu as pltpu

_LANE = 128
_MAX_TILE_DST = 256
_LOGW = _LANE                       # padded lane width of the el/er logit block
_VMEM_BUDGET = 44 * 1024 * 1024     # target footprint (fits v7x's 64 MiB VMEM)
_VMEM_LIMIT_CAP = 60 * 1024 * 1024


def _round_up(a, m):
    return ((a + m - 1) // m) * m


# --------------------------------------------------------------------------
# Kernel 1: fc projection + folded attention logits (node-row tiled).
#   feat   = x @ W          (bf16 out, MXU, f32 accumulate)
#   logits = x @ W_log      (f32 out; cols [0:H] = el, [H:2H] = er)
# --------------------------------------------------------------------------
def _fc_kernel(x_ref, w_ref, wlog_ref, feat_ref, log_ref):
    xb = x_ref[...].astype(jnp.bfloat16)
    feat_ref[...] = jnp.dot(xb, w_ref[...],
                            preferred_element_type=jnp.float32
                            ).astype(feat_ref.dtype)
    log_ref[...] = jnp.dot(xb, wlog_ref[...],
                           preferred_element_type=jnp.float32)


# --------------------------------------------------------------------------
# Kernel 2: GAT attention + aggregation for one tile of destination rows.
# --------------------------------------------------------------------------
def _gat_attn_kernel(feat_ref, el_ref, er_ref, b_ref, adj_ref, ew_ref, out_ref,
                     *, num_heads, out_feats, negative_slope, relu_out):
    H, F = num_heads, out_feats
    feat = feat_ref[...]                          # (Np, H*F) bf16, resident
    el_all = el_ref[...]                          # (H, Np)  f32  source logits
    er_all = er_ref[...]                          # (T, H)   f32  dst logits
    bias = b_ref[...]                             # (1, H*F) f32
    # One mask per tile, reused by every head (no per-head adj temporaries).
    mask = adj_ref[...].astype(jnp.float32) > 0.0  # (T, Np) bool
    ew = ew_ref[...].astype(jnp.float32)           # (T, Np) f32, converted once

    neg_big = jnp.float32(-1e30)
    head_outs = []
    for h in range(H):                            # static unroll, H is small
        cols = slice(h * F, (h + 1) * F)          # lane-aligned (F % 128 == 0)

        # e[dst, src] = leaky_relu(el[src] + er[dst]), masked to real edges.
        e = el_all[h:h + 1, :] + er_all[:, h:h + 1]            # (T, Np)
        e = jnp.where(e > 0, e, negative_slope * e)
        e = jnp.where(mask, e, neg_big)

        # Edge softmax over incoming edges of each destination row.
        e_max = jnp.max(e, axis=1, keepdims=True)
        p = jnp.where(mask, jnp.exp(e - e_max), 0.0)           # (T, Np)
        denom = jnp.sum(p, axis=1, keepdims=True)
        inv = pl.reciprocal(jnp.maximum(denom, 1e-30), approx=True)   # EUP

        # DGL: attention * edge_weight (post-softmax).  The per-row softmax
        # normalization `inv` is applied to the (T, F) matmul result instead
        # of the (T, Np) matrix.
        pw = (p * ew).astype(jnp.bfloat16)
        oh = jnp.dot(pw, feat[:, cols],
                     preferred_element_type=jnp.float32)       # (T, F)  MXU
        head_outs.append(oh * inv)

    out = head_outs[0] if H == 1 else jnp.concatenate(head_outs, axis=1)
    out = out + bias
    if relu_out:
        out = jnp.maximum(out, 0.0)
    out_ref[...] = out.astype(out_ref.dtype)      # single lane-dense store


# --------------------------------------------------------------------------
# VMEM budgeting / tile selection.
# --------------------------------------------------------------------------
def _attn_vmem_bytes(tile, n_p, hf, out_bytes):
    feat = 2 * n_p * hf * 2                 # resident bf16 feat (2 buffers)
    small = 2 * (8 * n_p * 4 + tile * _LANE * 4 + 8 * hf * 4)   # el / er / bias
    adj = 2 * tile * n_p * 1
    ew = 2 * tile * n_p * 2
    out = 2 * tile * hf * out_bytes
    tmp = 4 * tile * n_p * 4                # e / p / pw / mask live set
    return feat + small + adj + ew + out + tmp + (1 << 20)


def _choose_tile(n_p0, hf, out_bytes):
    tile = min(_MAX_TILE_DST, n_p0)
    if n_p0 >= 2 * _LANE:                   # >= 2 "parallel" steps for megacore
        tile = min(tile, max(_LANE, ((n_p0 // 2) // _LANE) * _LANE))
    while tile > _LANE and _attn_vmem_bytes(tile, n_p0, hf, out_bytes) > _VMEM_BUDGET:
        tile -= _LANE
    return max(tile, _LANE)


# --------------------------------------------------------------------------
# One GATConv layer (padded shapes), two pallas_calls.
# --------------------------------------------------------------------------
def gatconv_layer(x_p, w_p, wlog_p, b_p, adj_p, ew_p, *, num_heads, f_p,
                  relu_out, tile, out_dtype, vmem_limit):
    n_p = adj_p.shape[0]
    in_p = x_p.shape[1]
    hf = num_heads * f_p
    grid = (n_p // tile,)
    cparams = pltpu.CompilerParams(dimension_semantics=("parallel",),
                                   vmem_limit_bytes=vmem_limit)

    feat, logits = pl.pallas_call(
        _fc_kernel,
        out_shape=(jax.ShapeDtypeStruct((n_p, hf), jnp.bfloat16),
                   jax.ShapeDtypeStruct((n_p, _LOGW), jnp.float32)),
        grid=grid,
        in_specs=[pl.BlockSpec((tile, in_p), lambda i: (i, 0)),
                  pl.BlockSpec((in_p, hf), lambda i: (0, 0)),
                  pl.BlockSpec((in_p, _LOGW), lambda i: (0, 0))],
        out_specs=[pl.BlockSpec((tile, hf), lambda i: (i, 0)),
                   pl.BlockSpec((tile, _LOGW), lambda i: (i, 0))],
        compiler_params=cparams,
        cost_estimate=pl.CostEstimate(
            flops=2 * n_p * in_p * (hf + _LOGW), transcendentals=0,
            bytes_accessed=(n_p * in_p * x_p.dtype.itemsize
                            + 2 * in_p * (hf + _LOGW)
                            + n_p * (2 * hf + 4 * _LOGW))),
    )(x_p, w_p, wlog_p)

    # Wrapper-side layout plumbing: lane-dense (H, N_p) source logits and
    # dst-tiled (N_p, H) destination logits.
    el_t = logits[:, :num_heads].T
    er = logits[:, num_heads:2 * num_heads]

    kern = functools.partial(_gat_attn_kernel, num_heads=num_heads,
                             out_feats=f_p, negative_slope=0.2,
                             relu_out=relu_out)
    out_bytes = 2 if out_dtype == jnp.bfloat16 else 4
    cost = pl.CostEstimate(
        flops=2 * num_heads * n_p * n_p * f_p + 10 * num_heads * n_p * n_p,
        transcendentals=num_heads * n_p * n_p,
        bytes_accessed=n_p * n_p * 3 + n_p * hf * (2 + out_bytes))

    out = pl.pallas_call(
        kern,
        out_shape=jax.ShapeDtypeStruct((n_p, hf), out_dtype),
        grid=grid,
        in_specs=[pl.BlockSpec((n_p, hf), lambda i: (0, 0)),         # feat (resident bf16)
                  pl.BlockSpec((num_heads, n_p), lambda i: (0, 0)),  # el (all sources)
                  pl.BlockSpec((tile, num_heads), lambda i: (i, 0)), # er (dst tile)
                  pl.BlockSpec((1, hf), lambda i: (0, 0)),           # bias
                  pl.BlockSpec((tile, n_p), lambda i: (i, 0)),       # adj int8 tile
                  pl.BlockSpec((tile, n_p), lambda i: (i, 0))],      # ew bf16 tile
        out_specs=pl.BlockSpec((tile, hf), lambda i: (i, 0)),
        compiler_params=cparams,
        cost_estimate=cost,
    )(feat, el_t, er, b_p, adj_p, ew_p)
    return out


# --------------------------------------------------------------------------
# Padding helpers (head-blocked feature layout; zero padding is inert).
# --------------------------------------------------------------------------
def _pad_head_cols(w, num_heads, f, f_p, rows_p=None, dtype=jnp.float32):
    rows = w.shape[0]
    rows_p = rows if rows_p is None else rows_p
    out = jnp.zeros((rows_p, num_heads * f_p), jnp.float32)
    for h in range(num_heads):
        out = out.at[:rows, h * f_p:h * f_p + f].set(w[:, h * f:(h + 1) * f])
    return out.astype(dtype)


def _pad_w2(w2, heads1, hidden, f1_p, out_dim, f2_p, dtype=jnp.float32):
    out = jnp.zeros((heads1 * f1_p, f2_p), jnp.float32)
    for h in range(heads1):
        out = out.at[h * f1_p:h * f1_p + hidden, :out_dim].set(
            w2[h * hidden:(h + 1) * hidden, :])
    return out.astype(dtype)


def _fold_attn_into_fc_cols(w_el, w_er, rows_p):
    """Pack per-head el/er projection columns into one 128-lane block."""
    rows, num_heads = w_el.shape
    assert 2 * num_heads <= _LOGW
    out = jnp.zeros((rows_p, _LOGW), jnp.float32)
    out = out.at[:rows, :num_heads].set(w_el)
    out = out.at[:rows, num_heads:2 * num_heads].set(w_er)
    return out.astype(jnp.bfloat16)


# --------------------------------------------------------------------------
# Full GAT forward (conv1 -> relu (in-kernel) -> conv2).
# --------------------------------------------------------------------------
def gat_forward(params, adj, ew, x, *, num_heads, hidden_dim, out_dim):
    n, in_dim = x.shape
    in_p = _round_up(in_dim, _LANE)
    f1_p = _round_up(hidden_dim, _LANE)
    f2_p = _round_up(out_dim, _LANE)
    hf_max = max(num_heads * f1_p, f2_p)

    n_p0 = _round_up(max(n, 1), _LANE)
    tile = _choose_tile(n_p0, hf_max, out_bytes=4)
    n_p = _round_up(max(n, 1), tile)
    vmem_limit = int(min(_VMEM_LIMIT_CAP,
                         max(32 * 1024 * 1024,
                             _attn_vmem_bytes(tile, n_p, hf_max, 4) * 5 // 4)))

    # Pad node features / graph; O(N^2) inputs shrunk to int8 / bf16.
    # TODO(synk): bit-pack adj (1 bit/edge) and stream ew as fp8 on v6e/v7x to
    # cut the dominant O(N^2) HBM bytes further.
    x_p = jnp.zeros((n_p, in_p), jnp.float32).at[:n, :in_dim].set(x)
    adj_p = jnp.zeros((n_p, n_p), jnp.int8).at[:n, :n].set(adj.astype(jnp.int8))
    ew_p = jnp.zeros((n_p, n_p), jnp.bfloat16).at[:n, :n].set(
        ew.astype(jnp.bfloat16))

    # ---- layer 1 parameters (head-blocked, padded; matmul operands bf16) ---
    w1_p = _pad_head_cols(params["w1"], num_heads, hidden_dim, f1_p,
                          rows_p=in_p, dtype=jnp.bfloat16)
    w1r = params["w1"].reshape(in_dim, num_heads, hidden_dim)
    wlog1 = _fold_attn_into_fc_cols(
        jnp.einsum("dhf,hf->dh", w1r, params["al1"]),
        jnp.einsum("dhf,hf->dh", w1r, params["ar1"]),
        rows_p=in_p)
    b1_p = _pad_head_cols(params["b1"], num_heads, hidden_dim, f1_p)

    h1 = gatconv_layer(x_p, w1_p, wlog1, b1_p, adj_p, ew_p,
                       num_heads=num_heads, f_p=f1_p, relu_out=True,
                       tile=tile, out_dtype=jnp.bfloat16,
                       vmem_limit=vmem_limit)
    # outer F.relu is redundant with conv1's in-kernel relu -> dropped.

    # ---- layer 2 parameters (rows follow layer-1's padded layout) ----------
    w2_p = _pad_w2(params["w2"], num_heads, hidden_dim, f1_p, out_dim, f2_p,
                   dtype=jnp.bfloat16)
    v_el2 = params["w2"] @ params["al2"][0]
    v_er2 = params["w2"] @ params["ar2"][0]
    wlog2 = _fold_attn_into_fc_cols(
        _pad_head_cols(v_el2[None, :], num_heads, hidden_dim, f1_p).T,
        _pad_head_cols(v_er2[None, :], num_heads, hidden_dim, f1_p).T,
        rows_p=num_heads * f1_p)
    b2_p = jnp.zeros((1, f2_p), jnp.float32).at[:, :out_dim].set(params["b2"])

    out_p = gatconv_layer(h1, w2_p, wlog2, b2_p, adj_p, ew_p,
                          num_heads=1, f_p=f2_p, relu_out=False,
                          tile=tile, out_dtype=jnp.float32,
                          vmem_limit=vmem_limit)
    # TODO(synk): fuse conv1+conv2 into one pallas_call (stream adj/ew once per
    # forward) and add a source-axis online-softmax blocking so the attention
    # VMEM footprint becomes independent of N; pack all heads into one 128-lane
    # block when num_heads*out_feats <= 128.
    return out_p[:n, :out_dim]


if __name__ == "__main__":
    N, IN_DIM, HIDDEN, OUT_DIM, HEADS = 8, 4, 8, 4, 2

    key = jax.random.PRNGKey(0)
    ks = jax.random.split(key, 12)

    # Graph (dense representation) + node features.
    x = jax.random.normal(ks[0], (N, IN_DIM), jnp.float32)
    adj = (jax.random.uniform(ks[1], (N, N)) < 0.5).astype(jnp.float32)
    ew = jax.random.uniform(ks[2], (N, N), jnp.float32) * adj

    # Deterministic synthetic parameters (shapes from GATConv.__init__).
    params = {
        # conv1: fc (IN_DIM -> HEADS*HIDDEN), attn_l/attn_r (HEADS, HIDDEN), bias
        "w1": 0.1 * jax.random.normal(ks[3], (IN_DIM, HEADS * HIDDEN), jnp.float32),
        "al1": 0.1 * jax.random.normal(ks[4], (HEADS, HIDDEN), jnp.float32),
        "ar1": 0.1 * jax.random.normal(ks[5], (HEADS, HIDDEN), jnp.float32),
        "b1": jnp.zeros((1, HEADS * HIDDEN), jnp.float32),
        # conv2: fc (HEADS*HIDDEN -> OUT_DIM), attn (1, OUT_DIM), bias
        "w2": 0.1 * jax.random.normal(ks[6], (HEADS * HIDDEN, OUT_DIM), jnp.float32),
        "al2": 0.1 * jax.random.normal(ks[7], (1, OUT_DIM), jnp.float32),
        "ar2": 0.1 * jax.random.normal(ks[8], (1, OUT_DIM), jnp.float32),
        "b2": jnp.zeros((1, OUT_DIM), jnp.float32),
    }

    out = gat_forward(params, adj, ew, x,
                      num_heads=HEADS, hidden_dim=HIDDEN, out_dim=OUT_DIM)
    out = jax.block_until_ready(out)
    assert out.shape == (N, OUT_DIM), out.shape
    assert bool(jnp.all(jnp.isfinite(out)))
    print("KERNEL_OK")
</pallas_src>

<mosaic_0001>
module attributes {stable_mosaic.version = 11 : i64} {
  func.func @_fc_kernel(%arg0: i32, %arg1: memref<128x128xf32, #tpu.memory_space<vmem>>, %arg2: memref<128x256xbf16, #tpu.memory_space<vmem>>, %arg3: memref<128x128xbf16, #tpu.memory_space<vmem>>, %arg4: memref<128x256xbf16, #tpu.memory_space<vmem>>, %arg5: memref<128x128xf32, #tpu.memory_space<vmem>>) attributes {dimension_semantics = [#tpu.dimension_semantics<parallel>], iteration_bounds = array<i64: 1>, scalar_prefetch = 0 : i64, scratch_operands = 0 : i64, tpu.core_type = #tpu.core_type<tc>, window_params = [{transform_indices = @transform_0, window_bounds = array<i64: 128, 128>}, {pipeline_mode = #tpu.pipeline_mode<synchronous>, transform_indices = @transform_1, window_bounds = array<i64: 128, 256>}, {pipeline_mode = #tpu.pipeline_mode<synchronous>, transform_indices = @transform_2, window_bounds = array<i64: 128, 128>}, {transform_indices = @transform_3, window_bounds = array<i64: 128, 256>}, {transform_indices = @transform_4, window_bounds = array<i64: 128, 128>}]} {
    %c0 = arith.constant 0 : index
    %c0_0 = arith.constant 0 : index
    %0 = vector.load %arg1[%c0, %c0_0] : memref<128x128xf32, #tpu.memory_space<vmem>>, vector<128x128xf32>
    %1 = arith.truncf %0 : vector<128x128xf32> to vector<128x128xbf16>
    %c0_1 = arith.constant 0 : index
    %c0_2 = arith.constant 0 : index
    %2 = vector.load %arg2[%c0_1, %c0_2] : memref<128x256xbf16, #tpu.memory_space<vmem>>, vector<128x256xbf16>
    %cst = arith.constant dense<0.000000e+00> : vector<128x256xf32>
    %3 = tpu.matmul %1, %2, %cst {dimension_numbers = #tpu.dot_dimension_numbers<[1], [0], [0], [1], [0, 0, 1, 1], [], []>} : vector<128x128xbf16>, vector<128x256xbf16>, vector<128x256xf32> -> vector<128x256xf32>
    %4 = arith.truncf %3 : vector<128x256xf32> to vector<128x256xbf16>
    %c0_3 = arith.constant 0 : index
    %c0_4 = arith.constant 0 : index
    %5 = vector.load %arg4[%c0_3, %c0_4] : memref<128x256xbf16, #tpu.memory_space<vmem>>, vector<128x256xbf16>
    tpu.vector_store %arg4[%c0_3, %c0_4], %4 {strides = array<i32>} : memref<128x256xbf16, #tpu.memory_space<vmem>>, vector<128x256xbf16>,
    %c0_5 = arith.constant 0 : index
    %c0_6 = arith.constant 0 : index
    %6 = vector.load %arg3[%c0_5, %c0_6] : memref<128x128xbf16, #tpu.memory_space<vmem>>, vector<128x128xbf16>
    %cst_7 = arith.constant dense<0.000000e+00> : vector<128x128xf32>
    %7 = tpu.matmul %1, %6, %cst_7 {dimension_numbers = #tpu.dot_dimension_numbers<[1], [0], [0], [1], [0, 0, 1, 1], [], []>} : vector<128x128xbf16>, vector<128x128xbf16>, vector<128x128xf32> -> vector<128x128xf32>
    %c0_8 = arith.constant 0 : index
    %c0_9 = arith.constant 0 : index
    %8 = vector.load %arg5[%c0_8, %c0_9] : memref<128x128xf32, #tpu.memory_space<vmem>>, vector<128x128xf32>
    tpu.vector_store %arg5[%c0_8, %c0_9], %7 {strides = array<i32>} : memref<128x128xf32, #tpu.memory_space<vmem>>, vector<128x128xf32>,
    return
  }
  func.func @transform_0(%arg0: i32) -> (i32, i32) {
    %c0_i32 = arith.constant 0 : i32
    %c0_i32_0 = arith.constant 0 : i32
    return %arg0, %c0_i32 : i32, i32
  }
  func.func @transform_1(%arg0: i32) -> (i32, i32) {
    %c0_i32 = arith.constant 0 : i32
    %c0_i32_0 = arith.constant 0 : i32
    %c0_i32_1 = arith.constant 0 : i32
    return %c0_i32, %c0_i32_0 : i32, i32
  }
  func.func @transform_2(%arg0: i32) -> (i32, i32) {
    %c0_i32 = arith.constant 0 : i32
    %c0_i32_0 = arith.constant 0 : i32
    %c0_i32_1 = arith.constant 0 : i32
    return %c0_i32, %c0_i32_0 : i32, i32
  }
  func.func @transform_3(%arg0: i32) -> (i32, i32) {
    %c0_i32 = arith.constant 0 : i32
    %c0_i32_0 = arith.constant 0 : i32
    return %arg0, %c0_i32 : i32, i32
  }
  func.func @transform_4(%arg0: i32) -> (i32, i32) {
    %c0_i32 = arith.constant 0 : i32
    %c0_i32_0 = arith.constant 0 : i32
    return %arg0, %c0_i32 : i32, i32
  }
}

</mosaic_0001>

<bundles_post_ra>
// kernel: tpu_custom_call.1
= control target key start
LH: loop header
LB: loop body
LE: loop exit
PB: predicated region body
PF: predicated region fallthrough
CT: control target
= control target key end

     0   :  { %10 = vsyncpa [#allocation3], 0  ;;  %s1002_s0 = inlined_call_operand.hbm [shape: f32[128,128], index: 0, kind: input, shape index: {}]   ;;  %s1003_s1 = inlined_call_operand.hbm [shape: bf16[128,256], index: 1, kind: input, shape index: {}]   ;;  %s1004_s2 = inlined_call_operand.hbm [shape: bf16[128,128], index: 2, kind: input, shape index: {}]   ;;  %s1005_s3 = inlined_call_operand.hbm [shape: bf16[128,256], index: 3, kind: output, shape index: {0}]   ;;  %s1006_s4 = inlined_call_operand.hbm [shape: f32[128,128], index: 4, kind: output, shape index: {1}]  }
   0x1   :  { %11 = vsyncpa [#allocation6], 0 }
   0x2   :  { %12 = vsyncpa [#allocation4], 0 }
   0x3   :  { %13 = vsyncpa [#allocation10], 0  ;;  %s880_s15 = smov [#allocation5]   ;;  %s881_s17 = smov [#allocation2]  }
   0x4   :  { %s31_s16 = sshll.u32 %s880_s15, 4  ;;  %s19_s18 = sshll.u32 %s881_s17, 4  ;;  %s32_s16 = int_to_ptr.vmem [resolvable:$true] %s31_s16  ;;  %s915_s18 = int_to_ptr.vmem [resolvable:$true] %s19_s18 }
   0x5   :  { %s762_s21 = scalar_lea.hbm %s1003_s1, 2048 }
   0x6   :  { %p763_p0 = scmp.ne.s32.totalorder %s1003_s1, %s762_s21  ;;  %p766_p1 = scmp.lt.u32.totalorder %s762_s21, %s1003_s1 }
   0x8   :  { %p768_p2 = pnand %p766_p1, %p763_p0 }
   0xa   :  { %771 = shalt.err (!%p768_p2)
}
   0xb   :  { %s772_s26 = scalar_lea.vmem %s32_s16, 2048  ;;  %p777_p4 = scmp.lt.s32.totalorder %s32_s16, %s32_s16 }
   0xc   :  { %p773_p3 = scmp.ne.s32.totalorder %s32_s16, %s772_s26  ;;  %p778_p5 = scmp.lt.s32.totalorder %s772_s26, %s772_s26 }
   0xe   :  { %p779_p6 = por %p778_p5, %p777_p4 }
  0x10   :  { %p780_p7 = pnand %p779_p6, %p773_p3 }
  0x12   :  { %783 = shalt.err (!%p780_p7)
}
  0x13   :  { %s882_s27 = smov 128   ;;  %s883_s28 = smov 8  }
  0x14   :  { %37 = dma.hbm_to_vmem [thread:$0]  %s1003_s1, 2048, %s32_s16, [#allocation6], %s882_s27, %s882_s27, %s883_s28  }
  0x15   :  { %s784_s7 = scalar_lea.hbm %s1002_s0, 2048 }
  0x16   :  { %p785_p8 = scmp.ne.s32.totalorder %s1002_s0, %s784_s7  ;;  %p788_p9 = scmp.lt.u32.totalorder %s784_s7, %s1002_s0 }
  0x18   :  { %p790_p10 = pnand %p788_p9, %p785_p8 }
  0x1a   :  { %793 = shalt.err (!%p790_p10)
}
  0x1b   :  { %s794_s12 = scalar_lea.vmem %s915_s18, 2048  ;;  %p799_p12 = scmp.lt.s32.totalorder %s915_s18, %s915_s18 }
  0x1c   :  { %p795_p11 = scmp.ne.s32.totalorder %s915_s18, %s794_s12  ;;  %p800_p13 = scmp.lt.s32.totalorder %s794_s12, %s794_s12 }
  0x1e   :  { %p801_p0 = por %p800_p13, %p799_p12 }
  0x20   :  { %p802_p1 = pnand %p801_p0, %p795_p11 }
  0x22   :  { %805 = shalt.err (!%p802_p1)
}
  0x23   :  { %25 = dma.hbm_to_vmem [thread:$0]  %s1002_s0, 2048, %s915_s18, [#allocation3], %s882_s27, %s882_s27, %s883_s28  }
  0x24   :  { %s884_s14 = smov [#allocation7]   ;;  %s806_s19 = scalar_lea.hbm %s1004_s2, 1024 }
  0x25   :  { %s43_s15 = sshll.u32 %s884_s14, 4  ;;  %p807_p2 = scmp.ne.s32.totalorder %s1004_s2, %s806_s19  ;;  %s44_s15 = int_to_ptr.vmem [resolvable:$true] %s43_s15 }
  0x26   :  { %p810_p3 = scmp.lt.u32.totalorder %s806_s19, %s1004_s2 }
  0x28   :  { %p812_p4 = pnand %p810_p3, %p807_p2 }
  0x2a   :  { %815 = shalt.err (!%p812_p4)
}
  0x2b   :  { %s816_s24 = scalar_lea.vmem %s44_s15, 1024  ;;  %p821_p6 = scmp.lt.s32.totalorder %s44_s15, %s44_s15 }
  0x2c   :  { %p817_p5 = scmp.ne.s32.totalorder %s44_s15, %s816_s24  ;;  %p822_p7 = scmp.lt.s32.totalorder %s816_s24, %s816_s24 }
  0x2e   :  { %p823_p8 = por %p822_p7, %p821_p6 }
  0x30   :  { %p824_p9 = pnand %p823_p8, %p817_p5 }
  0x32   :  { %827 = shalt.err (!%p824_p9)
}
  0x33   :  { %s885_s0 = smov 64   ;;  %s886_s18 = smov 4  }
  0x34   :  { %49 = dma.hbm_to_vmem [thread:$0]  %s1004_s2, 1024, %s44_s15, [#allocation6], %s885_s0, %s885_s0, %s886_s18  }
  0x35   :  { %872 = dma.done.wait [#allocation3], 2048  }
  0x36   :  { %873 = vsyncadd [#allocation3], 4294965248 }
  0x37   :  { %874 = dma.done.wait [#allocation6], 3072  }
  0x38   :  { %875 = vsyncadd [#allocation6], 4294964224  ;;  %v887_v0 = vmov 0   ;;  %v730_v1 = vld [vmem:[#allocation5 + $0x4] ss:$8 sps:$4 sm:$0xff]   ;;  %v756_v16 = vld [vmem:[#allocation7 + $0x10] sm:$0xff]  }
  0x39   :  { %212 = vmatprep.mubr.bf16.mxu0 %v887_v0  ;;  %v732_v2 = vld [vmem:[#allocation5] ss:$8 sps:$4 sm:$0xff]   ;;  %180 = vmatprep.subr.bf16.mxu0 %v730_v1  ;;  %v733_v3 = vld [vmem:[#allocation5 + $0x14] ss:$8 sps:$4 sm:$0xff]   ;;  %v735_v4 = vld [vmem:[#allocation5 + $0x10] ss:$8 sps:$4 sm:$0xff]  }
  0x3a   :  { %181 = vmatpush1.bf16.msra.mxu0 %v732_v2  ;;  %v736_v5 = vld [vmem:[#allocation5 + $0x24] ss:$8 sps:$4 sm:$0xff]   ;;  %v738_v6 = vld [vmem:[#allocation5 + $0x20] ss:$8 sps:$4 sm:$0xff]   ;;  %v739_v7 = vld [vmem:[#allocation5 + $0x34] ss:$8 sps:$4 sm:$0xff]  }
  0x3b   :  { %182 = vmatprep.subr.bf16.mxu0 %v733_v3  ;;  %v741_v8 = vld [vmem:[#allocation5 + $0x30] ss:$8 sps:$4 sm:$0xff]   ;;  %v742_v9 = vld [vmem:[#allocation5 + $0x44] ss:$8 sps:$4 sm:$0xff]   ;;  %v744_v14 = vld [vmem:[#allocation5 + $0x40] ss:$8 sps:$4 sm:$0xff]  }
  0x3c   :  { %v754_v10 = vld [vmem:[#allocation7] sm:$0xff]   ;;  %v61_v12 = vld [vmem:[#allocation2 + $0x8] sm:$0xff]  ;;  %v745_v17 = vld [vmem:[#allocation5 + $0x54] ss:$8 sps:$4 sm:$0xff]   ;;  %s888_s2 = smov [#allocation9]  }
  0x3d   :  { %v60_v11 = vld [vmem:[#allocation2] sm:$0xff]  ;;  %688 = vmatprep.subr.bf16.mxu1 %v754_v10  ;;  %v755_v13 = vld [vmem:[#allocation7 + $0x8] sm:$0xff]   ;;  %v747_v18 = vld [vmem:[#allocation5 + $0x50] ss:$8 sps:$4 sm:$0xff]   ;;  %s599_s29 = sshll.u32 %s888_s2, 4  ;;  %s600_s29 = int_to_ptr.vmem [resolvable:$true] %s599_s29 }
  0x3e   :  { %183 = vmatpush1.bf16.msra.mxu0 %v735_v4  ;;  %v76_v15 = vpack.c.bf16 %v61_v12, %v60_v11  ;;  %689 = vmatpush3.bf16.msra.mxu1 %v754_v10  ;;  %v757_v19 = vld [vmem:[#allocation7 + $0x18] sm:$0xff]   ;;  %v748_v20 = vld [vmem:[#allocation5 + $0x64] ss:$8 sps:$4 sm:$0xff]   ;;  %v750_v21 = vld [vmem:[#allocation5 + $0x60] ss:$8 sps:$4 sm:$0xff]   ;;  %s828_s30 = scalar_lea.vmem %s600_s29, 2048  ;;  %p833_p11 = scmp.lt.s32.totalorder %s600_s29, %s600_s29 }
  0x3f   :  { %184 = vmatprep.subr.bf16.mxu0 %v736_v5  ;;  %690 = vmatprep.subr.bf16.mxu1 %v755_v13  ;;  %v758_v22 = vld [vmem:[#allocation7 + $0x20] sm:$0xff]   ;;  %v751_v23 = vld [vmem:[#allocation5 + $0x74] ss:$8 sps:$4 sm:$0xff]   ;;  %v753_v24 = vld [vmem:[#allocation5 + $0x70] ss:$8 sps:$4 sm:$0xff]   ;;  %p829_p10 = scmp.ne.s32.totalorder %s600_s29, %s828_s30  ;;  %p834_p12 = scmp.lt.s32.totalorder %s828_s30, %s828_s30 }
  0x40   :  { %704 = vmatprep.mubr.bf16.mxu1 %v76_v15  ;;  %v759_v25 = vld [vmem:[#allocation7 + $0x28] sm:$0xff]   ;;  %v760_v26 = vld [vmem:[#allocation7 + $0x30] sm:$0xff]   ;;  %v63_v28 = vld [vmem:[#allocation2 + $0x18] sm:$0xff] }
  0x41   :  { %v62_v27 = vld [vmem:[#allocation2 + $0x10] sm:$0xff]  ;;  %v761_v29 = vld [vmem:[#allocation7 + $0x38] sm:$0xff]   ;;  %v64_v31 = vld [vmem:[#allocation2 + $0x20] sm:$0xff]  ;;  %p835_p13 = por %p834_p12, %p833_p11 }
  0x42   :  { %185 = vmatpush1.bf16.msra.mxu0 %v738_v6  ;;  %691 = vmatpush3.bf16.msra.mxu1 %v755_v13  ;;  %v77_v30 = vpack.c.bf16 %v63_v28, %v62_v27  ;;  %v65_v32 = vld [vmem:[#allocation2 + $0x28] sm:$0xff]  ;;  %v66_v34 = vld [vmem:[#allocation2 + $0x30] sm:$0xff]  ;;  %v67_v35 = vld [vmem:[#allocation2 + $0x38] sm:$0xff] }
  0x43   :  { %186 = vmatprep.subr.bf16.mxu0 %v739_v7  ;;  %692 = vmatprep.subr.bf16.mxu1 %v756_v16  ;;  %v78_v33 = vpack.c.bf16 %v65_v32, %v64_v31  ;;  %v68_v36 = vld [vmem:[#allocation2 + $0x40] sm:$0xff]  ;;  %v69_v37 = vld [vmem:[#allocation2 + $0x48] sm:$0xff]  ;;  %v79_v38 = vpack.c.bf16 %v67_v35, %v66_v34  ;;  %v70_v40 = vld [vmem:[#allocation2 + $0x50] sm:$0xff]  ;;  %p836_p0 = pnand %p835_p13, %p829_p10 }
  0x44   :  { %v80_v39 = vpack.c.bf16 %v69_v37, %v68_v36  ;;  %v71_v41 = vld [vmem:[#allocation2 + $0x58] sm:$0xff]  ;;  %v72_v42 = vld [vmem:[#allocation2 + $0x60] sm:$0xff]  ;;  %v73_v43 = vld [vmem:[#allocation2 + $0x68] sm:$0xff] }
  0x45   :  { %v81_v44 = vpack.c.bf16 %v71_v41, %v70_v40  ;;  %v82_v45 = vpack.c.bf16 %v73_v43, %v72_v42  ;;  %v74_v46 = vld [vmem:[#allocation2 + $0x70] sm:$0xff]  ;;  %v75_v47 = vld [vmem:[#allocation2 + $0x78] sm:$0xff] }
  0x46   :  { %187 = vmatpush1.bf16.msra.mxu0 %v741_v8  ;;  %693 = vmatpush3.bf16.msra.mxu1 %v756_v16  ;;  %v83_v48 = vpack.c.bf16 %v75_v47, %v74_v46 }
  0x47   :  { %188 = vmatprep.subr.bf16.mxu0 %v742_v9  ;;  %694 = vmatprep.subr.bf16.mxu1 %v757_v19 }
  0x4a   :  { %189 = vmatpush1.bf16.msra.mxu0 %v744_v14  ;;  %695 = vmatpush3.bf16.msra.mxu1 %v757_v19 }
  0x4b   :  { %190 = vmatprep.subr.bf16.mxu0 %v745_v17  ;;  %696 = vmatprep.subr.bf16.mxu1 %v758_v22 }
  0x4e   :  { %191 = vmatpush1.bf16.msra.mxu0 %v747_v18  ;;  %697 = vmatpush3.bf16.msra.mxu1 %v758_v22 }
  0x4f   :  { %192 = vmatprep.subr.bf16.mxu0 %v748_v20  ;;  %698 = vmatprep.subr.bf16.mxu1 %v759_v25 }
  0x52   :  { %193 = vmatpush1.bf16.msra.mxu0 %v750_v21  ;;  %699 = vmatpush3.bf16.msra.mxu1 %v759_v25 }
  0x53   :  { %194 = vmatprep.subr.bf16.mxu0 %v751_v23  ;;  %700 = vmatprep.subr.bf16.mxu1 %v760_v26 }
  0x56   :  { %195 = vmatpush1.bf16.msra.mxu0 %v753_v24  ;;  %701 = vmatpush3.bf16.msra.mxu1 %v760_v26 }
  0x57   :  { %702 = vmatprep.subr.bf16.mxu1 %v761_v29 }
  0x59   :  { %213 = vmatmul.mubr.bf16.vlgmr.msra.gmra.mrb[0].mxu0 %v76_v15 }
  0x5a   :  { %222 = vmatprep.mubr.bf16.mxu0 %v887_v0  ;;  %703 = vmatpush3.bf16.msra.mxu1 %v761_v29 }
  0x5d   :  { %705 = vmatmul.mubr.bf16.vlgmr.msra.gmra.mrb[0].mxu1 %v77_v30 }
  0x5e   :  { %708 = vmatprep.mubr.bf16.mxu1 %v78_v33 }
  0x61   :  { %223 = vmatmul.mubr.bf16.gmra.mrb[4].mxu0 %v77_v30 }
  0x62   :  { %232 = vmatprep.mubr.bf16.mxu0 %v887_v0 }
  0x65   :  { %709 = vmatmul.mubr.bf16.gmra.mrb[4].mxu1 %v79_v38 }
  0x66   :  { %712 = vmatprep.mubr.bf16.mxu1 %v80_v39 }
  0x69   :  { %233 = vmatmul.mubr.bf16.gmra.mrb[8].mxu0 %v78_v33 }
  0x6a   :  { %242 = vmatprep.mubr.bf16.mxu0 %v887_v0 }
  0x6d   :  { %713 = vmatmul.mubr.bf16.gmra.mrb[8].mxu1 %v81_v44 }
  0x6e   :  { %716 = vmatprep.mubr.bf16.mxu1 %v82_v45 }
  0x71   :  { %243 = vmatmul.mubr.bf16.gmra.mrb[12].mxu0 %v79_v38 }
  0x72   :  { %252 = vmatprep.mubr.bf16.mxu0 %v887_v0 }
  0x75   :  { %717 = vmatmul.mubr.bf16.gmra.mrb[12].mxu1 %v83_v48 }
  0x79   :  { %253 = vmatmul.mubr.bf16.gmra.mrb[16].mxu0 %v80_v39 }
  0x7a   :  { %262 = vmatprep.mubr.bf16.mxu0 %v887_v0 }
  0x81   :  { %263 = vmatmul.mubr.bf16.gmra.mrb[20].mxu0 %v81_v44 }
  0x82   :  { %272 = vmatprep.mubr.bf16.mxu0 %v887_v0 }
  0x89   :  { %273 = vmatmul.mubr.bf16.gmra.mrb[24].mxu0 %v82_v45 }
  0x8a   :  { %282 = vmatprep.mubr.bf16.mxu0 %v887_v0 }
  0x91   :  { %283 = vmatmul.mubr.bf16.gmra.mrb[28].mxu0 %v83_v48 }
 0x12c   :  { %v214_v49 = vpop.f32.mrb[0].mxu0 }
 0x12d   :  { %v216_v50 = vpop.f32.mrb[1].mxu0 }
 0x12e   :  { %v656_v51 = vpack.c.bf16 %v216_v50, %v214_v49  ;;  %v218_v52 = vpop.f32.mrb[2].mxu0 }
 0x12f   :  { %v220_v53 = vpop.f32.mrb[3].mxu0 }
 0x130   :  { %389 = vst [vmem:[#allocation8] sm:$0xff] %v656_v51  ;;  %v657_v54 = vpack.c.bf16 %v220_v53, %v218_v52  ;;  %v706_v60 = vpop.f32.mrb[0].mxu1 }
 0x131   :  { %568 = vst [vmem:[#allocation9 + $0x10] sm:$0xff] %v706_v60  ;;  %v503_v62 = vpop.f32.mrb[1].mxu1 }
 0x132   :  { %390 = vst [vmem:[#allocation8 + $0x8] sm:$0xff] %v657_v54  ;;  %566 = vst [vmem:[#allocation9] sm:$0xff] %v503_v62  ;;  %v707_v63 = vpop.f32.mrb[2].mxu1 }
 0x133   :  { %569 = vst [vmem:[#allocation9 + $0x18] sm:$0xff] %v707_v63  ;;  %v506_v0 = vpop.f32.mrb[3].mxu1 }
 0x134   :  { %v224_v55 = vpop.f32.mrb[4].mxu0  ;;  %567 = vst [vmem:[#allocation9 + $0x8] sm:$0xff] %v506_v0 }
 0x135   :  { %v226_v56 = vpop.f32.mrb[5].mxu0 }
 0x136   :  { %v658_v57 = vpack.c.bf16 %v226_v56, %v224_v55  ;;  %v228_v58 = vpop.f32.mrb[6].mxu0 }
 0x137   :  { %v230_v59 = vpop.f32.mrb[7].mxu0 }
 0x138   :  { %391 = vst [vmem:[#allocation8 + $0x10] sm:$0xff] %v658_v57  ;;  %v659_v61 = vpack.c.bf16 %v230_v59, %v228_v58  ;;  %v710_v6 = vpop.f32.mrb[4].mxu1 }
 0x139   :  { %572 = vst [vmem:[#allocation9 + $0x30] sm:$0xff] %v710_v6  ;;  %v519_v8 = vpop.f32.mrb[5].mxu1 }
 0x13a   :  { %392 = vst [vmem:[#allocation8 + $0x18] sm:$0xff] %v659_v61  ;;  %570 = vst [vmem:[#allocation9 + $0x20] sm:$0xff] %v519_v8  ;;  %v711_v9 = vpop.f32.mrb[6].mxu1 }
 0x13b   :  { %573 = vst [vmem:[#allocation9 + $0x38] sm:$0xff] %v711_v9  ;;  %v522_v10 = vpop.f32.mrb[7].mxu1 }
 0x13c   :  { %v234_v1 = vpop.f32.mrb[8].mxu0  ;;  %571 = vst [vmem:[#allocation9 + $0x28] sm:$0xff] %v522_v10 }
 0x13d   :  { %v236_v2 = vpop.f32.mrb[9].mxu0 }
 0x13e   :  { %v660_v3 = vpack.c.bf16 %v236_v2, %v234_v1  ;;  %v238_v4 = vpop.f32.mrb[10].mxu0 }
 0x13f   :  { %v240_v5 = vpop.f32.mrb[11].mxu0 }
 0x140   :  { %393 = vst [vmem:[#allocation8 + $0x20] sm:$0xff] %v660_v3  ;;  %v661_v7 = vpack.c.bf16 %v240_v5, %v238_v4  ;;  %v714_v16 = vpop.f32.mrb[8].mxu1 }
 0x141   :  { %576 = vst [vmem:[#allocation9 + $0x50] sm:$0xff] %v714_v16  ;;  %v535_v18 = vpop.f32.mrb[9].mxu1 }
 0x142   :  { %394 = vst [vmem:[#allocation8 + $0x28] sm:$0xff] %v661_v7  ;;  %574 = vst [vmem:[#allocation9 + $0x40] sm:$0xff] %v535_v18  ;;  %v715_v19 = vpop.f32.mrb[10].mxu1 }
 0x143   :  { %577 = vst [vmem:[#allocation9 + $0x58] sm:$0xff] %v715_v19  ;;  %v538_v20 = vpop.f32.mrb[11].mxu1 }
 0x144   :  { %v244_v11 = vpop.f32.mrb[12].mxu0  ;;  %575 = vst [vmem:[#allocation9 + $0x48] sm:$0xff] %v538_v20 }
 0x145   :  { %v246_v12 = vpop.f32.mrb[13].mxu0 }
 0x146   :  { %v662_v13 = vpack.c.bf16 %v246_v12, %v244_v11  ;;  %v248_v14 = vpop.f32.mrb[14].mxu0 }
 0x147   :  { %v250_v15 = vpop.f32.mrb[15].mxu0 }
 0x148   :  { %395 = vst [vmem:[#allocation8 + $0x30] sm:$0xff] %v662_v13  ;;  %v663_v17 = vpack.c.bf16 %v250_v15, %v248_v14  ;;  %v718_v26 = vpop.f32.mrb[12].mxu1 }
 0x149   :  { %580 = vst [vmem:[#allocation9 + $0x70] sm:$0xff] %v718_v26  ;;  %v551_v28 = vpop.f32.mrb[13].mxu1 }
 0x14a   :  { %396 = vst [vmem:[#allocation8 + $0x38] sm:$0xff] %v663_v17  ;;  %578 = vst [vmem:[#allocation9 + $0x60] sm:$0xff] %v551_v28  ;;  %v719_v29 = vpop.f32.mrb[14].mxu1 }
 0x14b   :  { %581 = vst [vmem:[#allocation9 + $0x78] sm:$0xff] %v719_v29  ;;  %v554_v30 = vpop.f32.mrb[15].mxu1 }
 0x14c   :  { %v254_v21 = vpop.f32.mrb[16].mxu0  ;;  %579 = vst [vmem:[#allocation9 + $0x68] sm:$0xff] %v554_v30 }
 0x14d   :  { %v256_v22 = vpop.f32.mrb[17].mxu0 }
 0x14e   :  { %v664_v23 = vpack.c.bf16 %v256_v22, %v254_v21  ;;  %v258_v24 = vpop.f32.mrb[18].mxu0 }
 0x14f   :  { %v260_v25 = vpop.f32.mrb[19].mxu0 }
 0x150   :  { %397 = vst [vmem:[#allocation8 + $0x40] sm:$0xff] %v664_v23  ;;  %v665_v27 = vpack.c.bf16 %v260_v25, %v258_v24 }
 0x152   :  { %398 = vst [vmem:[#allocation8 + $0x48] sm:$0xff] %v665_v27 }
 0x154   :  { %v264_v31 = vpop.f32.mrb[20].mxu0 }
 0x155   :  { %839 = shalt.err (!%p836_p0)
}
 0x156   :  { %s840_s7 = scalar_lea.hbm %s1006_s4, 2048 }
 0x157   :  { %p841_p1 = scmp.ne.s32.totalorder %s1006_s4, %s840_s7  ;;  %p844_p2 = scmp.lt.u32.totalorder %s840_s7, %s1006_s4 }
 0x159   :  { %p846_p3 = pnand %p844_p2, %p841_p1 }
 0x15b   :  { %849 = shalt.err (!%p846_p3)
}
 0x15c   :  { %605 = dma.vmem_to_hbm [thread:$0]  %s600_s29, 2048, %s1006_s4, [#allocation10], %s882_s27, %s882_s27, %s883_s28   ;;  %v266_v32 = vpop.f32.mrb[21].mxu0 }
 0x15d   :  { %v666_v33 = vpack.c.bf16 %v266_v32, %v264_v31  ;;  %v268_v34 = vpop.f32.mrb[22].mxu0  ;;  %s889_s13 = smov [#allocation8]  }
 0x15e   :  { %v270_v35 = vpop.f32.mrb[23].mxu0  ;;  %s587_s14 = sshll.u32 %s889_s13, 4  ;;  %s588_s14 = int_to_ptr.vmem [resolvable:$true] %s587_s14 }
 0x15f   :  { %399 = vst [vmem:[#allocation8 + $0x50] sm:$0xff] %v666_v33  ;;  %v667_v36 = vpack.c.bf16 %v270_v35, %v268_v34  ;;  %v274_v37 = vpop.f32.mrb[24].mxu0  ;;  %s850_s4 = scalar_lea.vmem %s588_s14, 2048  ;;  %p855_p5 = scmp.lt.s32.totalorder %s588_s14, %s588_s14 }
 0x160   :  { %v276_v38 = vpop.f32.mrb[25].mxu0  ;;  %p851_p4 = scmp.ne.s32.totalorder %s588_s14, %s850_s4  ;;  %p856_p6 = scmp.lt.s32.totalorder %s850_s4, %s850_s4 }
 0x161   :  { %400 = vst [vmem:[#allocation8 + $0x58] sm:$0xff] %v667_v36  ;;  %v668_v39 = vpack.c.bf16 %v276_v38, %v274_v37  ;;  %v278_v40 = vpop.f32.mrb[26].mxu0 }
 0x162   :  { %v280_v41 = vpop.f32.mrb[27].mxu0  ;;  %p857_p7 = por %p856_p6, %p855_p5 }
 0x163   :  { %401 = vst [vmem:[#allocation8 + $0x60] sm:$0xff] %v668_v39  ;;  %v669_v42 = vpack.c.bf16 %v280_v41, %v278_v40 }
 0x164   :  { %v284_v43 = vpop.f32.mrb[28].mxu0  ;;  %p858_p8 = pnand %p857_p7, %p851_p4 }
 0x165   :  { %402 = vst [vmem:[#allocation8 + $0x68] sm:$0xff] %v669_v42  ;;  %v286_v44 = vpop.f32.mrb[29].mxu0 }
 0x166   :  { %v670_v45 = vpack.c.bf16 %v286_v44, %v284_v43  ;;  %v288_v46 = vpop.f32.mrb[30].mxu0 }
 0x167   :  { %v290_v47 = vpop.f32.mrb[31].mxu0 }
 0x168   :  { %403 = vst [vmem:[#allocation8 + $0x70] sm:$0xff] %v670_v45  ;;  %v671_v48 = vpack.c.bf16 %v290_v47, %v288_v46 }
 0x16a   :  { %404 = vst [vmem:[#allocation8 + $0x78] sm:$0xff] %v671_v48 }
 0x16b   :  { %861 = shalt.err (!%p858_p8)
}
 0x16c   :  { %s862_s17 = scalar_lea.hbm %s1005_s3, 2048 }
 0x16d   :  { %p863_p9 = scmp.ne.s32.totalorder %s1005_s3, %s862_s17  ;;  %p866_p10 = scmp.lt.u32.totalorder %s862_s17, %s1005_s3 }
 0x16f   :  { %p868_p11 = pnand %p866_p10, %p863_p9 }
 0x171   :  { %871 = shalt.err (!%p868_p11)
}
 0x172   :  { %593 = dma.vmem_to_hbm [thread:$0]  %s588_s14, 2048, %s1005_s3, [#allocation4], %s882_s27, %s882_s27, %s883_s28  }
 0x173   :  { %876 = dma.done.wait [#allocation4], 2048  }
 0x174   :  { %877 = vsyncadd [#allocation4], 4294965248 }
 0x175   :  { %878 = dma.done.wait [#allocation10], 2048  }
 0x176   :  { %879 = vsyncadd [#allocation10], 4294965248 }
 0x177   :  { %612 = vsyncpa [#allocation3], 1 }
 0x178   :  { %613 = vsyncpa [#allocation6], 1 }
 0x179   :  { %614 = vsyncpa [#allocation4], 1 }
 0x17a   :  { %615 = vsyncpa [#allocation10], 1 }

</bundles_post_ra>
